<compile_context>
chip_gen: v7x
topology: tpu7x:2x2x1
jax: 0.10.0
libtpu: 0.0.40
codegen_flags: <defaults>
</compile_context>

<pallas_src>
import jax
import jax.numpy as jnp
from jax.experimental import pallas as pl
from jax.experimental.pallas import tpu as pltpu


SUBLANE = 8        # batch tiles (when tiled) are multiples of the sublane width
MAX_TB = 1024      # cap on rows per grid step (amortizes ~0.35 us/step overhead)


def _cdiv(a, b):
    return (a + b - 1) // b


def _round_up(n, m):
    return ((n + m - 1) // m) * m


def _mlp_kernel(x_ref, w1_ref, b1_ref, w2_ref, b2_ref, w3_ref, b3_ref, o_ref):
    # All operands are f32; MXU accumulates in f32 via preferred_element_type.
    # hidden layer 1: Linear + ReLU
    h = jnp.dot(x_ref[...], w1_ref[...], preferred_element_type=jnp.float32)
    h = jnp.maximum(h + b1_ref[...], 0.0)
    # hidden layer 2: Linear + ReLU
    h = jnp.dot(h, w2_ref[...], preferred_element_type=jnp.float32)
    h = jnp.maximum(h + b2_ref[...], 0.0)
    # output layer: Linear (no activation), natural n_out lanes (no padding)
    o_ref[...] = (
        jnp.dot(h, w3_ref[...], preferred_element_type=jnp.float32)
        + b3_ref[...]
    )


@jax.jit
def net_forward(x, params, t):
    """Forward pass of Net (MLP branch).  x: [B, n_inputs] f32; t is unused."""
    del t  # MLP (non-cifar/isic) branch ignores the task id
    (w1, b1), (w2, b2), (w3, b3) = params
    B, n_in = x.shape
    n_out = w3.shape[1]

    # --- batch tiling -------------------------------------------------------
    # Large tiles (up to MAX_TB rows) to amortize per-grid-step overhead;
    # >=2 tiles when B >= 16 so both v7x TensorCores get work; ragged last
    # tile is handled by Pallas masking (no batch padding in the wrapper).
    n_tiles = _cdiv(B, MAX_TB)
    if n_tiles == 1 and B >= 2 * SUBLANE:
        n_tiles = 2
    if n_tiles == 1:
        tb = B  # full-dim block: exempt from the (8,128) constraint
    else:
        tb = _round_up(_cdiv(B, n_tiles), SUBLANE)
        n_tiles = _cdiv(B, tb)

    def fixed(shape):
        # weights/biases: same full-array block at every grid step
        # (constant block index => DMA'd once, resident across steps)
        return pl.BlockSpec(shape, lambda i: (0,) * len(shape))

    return pl.pallas_call(
        _mlp_kernel,
        out_shape=jax.ShapeDtypeStruct((B, n_out), jnp.float32),
        grid=(n_tiles,),
        in_specs=[
            pl.BlockSpec((tb, n_in), lambda i: (i, 0)),   # x: tiled over batch
            fixed(w1.shape), fixed(b1.shape),
            fixed(w2.shape), fixed(b2.shape),
            fixed(w3.shape), fixed(b3.shape),
        ],
        out_specs=pl.BlockSpec((tb, n_out), lambda i: (i, 0)),
        compiler_params=pltpu.CompilerParams(
            dimension_semantics=("parallel",),
            vmem_limit_bytes=32 * 1024 * 1024,
        ),
    )(x, w1, b1, w2, b2, w3, b3)


def init_mlp_params(key, sizes):
    """PyTorch-Linear-style init: U(-1/sqrt(fan_in), 1/sqrt(fan_in)).

    Weights returned already transposed to (in, out); biases as (1, out)."""
    params = []
    for fan_in, fan_out in zip(sizes[:-1], sizes[1:]):
        key, kw, kb = jax.random.split(key, 3)
        bound = 1.0 / jnp.sqrt(jnp.float32(fan_in))
        w = jax.random.uniform(kw, (fan_in, fan_out), jnp.float32, -bound, bound)
        b = jax.random.uniform(kb, (1, fan_out), jnp.float32, -bound, bound)
        params.append((w, b))
    return params


def net_forward_ref(x, params):
    h = x
    for i, (w, b) in enumerate(params):
        h = h @ w + b
        if i < len(params) - 1:
            h = jnp.maximum(h, 0.0)
    return h


if __name__ == "__main__":
    # Small shapes consistent with the module: nl=2 hidden layers, nh=32 hidden
    # units, n_inputs=32 features, n_outputs=8 classes, batch=2.
    B, n_inputs, nh, n_outputs = 2, 32, 32, 8
    sizes = [n_inputs, nh, nh, n_outputs]   # [n_inputs] + [nh]*nl + [n_outputs]

    key = jax.random.PRNGKey(0)
    key, kx = jax.random.split(key)
    x = jax.random.normal(kx, (B, n_inputs), jnp.float32)
    t = jnp.int32(0)  # task id; unused for the MLP (non-cifar/isic) branch

    params = init_mlp_params(key, sizes)

    out = net_forward(x, params, t)
    out = jax.block_until_ready(out)

    ref = net_forward_ref(x, params)
    assert out.shape == (B, n_outputs)
    # Operands stay f32 end-to-end; the only residual difference vs. the XLA
    # reference is the MXU default-precision pass count, so a tight-ish
    # tolerance is sufficient (no bf16 data casting anywhere).
    assert jnp.allclose(out, ref, atol=5e-3, rtol=5e-3), "mismatch vs JAX reference"

    print("KERNEL_OK")
</pallas_src>

<mosaic_0001>
module attributes {stable_mosaic.version = 11 : i64} {
  func.func @_mlp_kernel(%arg0: i32, %arg1: memref<2x32xf32, #tpu.memory_space<vmem>>, %arg2: memref<32x32xf32, #tpu.memory_space<vmem>>, %arg3: memref<1x32xf32, #tpu.memory_space<vmem>>, %arg4: memref<32x32xf32, #tpu.memory_space<vmem>>, %arg5: memref<1x32xf32, #tpu.memory_space<vmem>>, %arg6: memref<32x8xf32, #tpu.memory_space<vmem>>, %arg7: memref<1x8xf32, #tpu.memory_space<vmem>>, %arg8: memref<2x8xf32, #tpu.memory_space<vmem>>) attributes {dimension_semantics = [#tpu.dimension_semantics<parallel>], iteration_bounds = array<i64: 1>, scalar_prefetch = 0 : i64, scratch_operands = 0 : i64, tpu.core_type = #tpu.core_type<tc>, window_params = [{transform_indices = @transform_0, window_bounds = array<i64: 2, 32>}, {pipeline_mode = #tpu.pipeline_mode<synchronous>, transform_indices = @transform_1, window_bounds = array<i64: 32, 32>}, {pipeline_mode = #tpu.pipeline_mode<synchronous>, transform_indices = @transform_2, window_bounds = array<i64: 1, 32>}, {pipeline_mode = #tpu.pipeline_mode<synchronous>, transform_indices = @transform_3, window_bounds = array<i64: 32, 32>}, {pipeline_mode = #tpu.pipeline_mode<synchronous>, transform_indices = @transform_4, window_bounds = array<i64: 1, 32>}, {pipeline_mode = #tpu.pipeline_mode<synchronous>, transform_indices = @transform_5, window_bounds = array<i64: 32, 8>}, {pipeline_mode = #tpu.pipeline_mode<synchronous>, transform_indices = @transform_6, window_bounds = array<i64: 1, 8>}, {transform_indices = @transform_7, window_bounds = array<i64: 2, 8>}]} {
    %c0 = arith.constant 0 : index
    %c0_0 = arith.constant 0 : index
    %0 = vector.load %arg1[%c0, %c0_0] : memref<2x32xf32, #tpu.memory_space<vmem>>, vector<2x32xf32>
    %c0_1 = arith.constant 0 : index
    %c0_2 = arith.constant 0 : index
    %1 = vector.load %arg2[%c0_1, %c0_2] : memref<32x32xf32, #tpu.memory_space<vmem>>, vector<32x32xf32>
    %cst = arith.constant dense<0.000000e+00> : vector<2x32xf32>
    %2 = tpu.matmul %0, %1, %cst {dimension_numbers = #tpu.dot_dimension_numbers<[1], [0], [0], [1], [0, 0, 1, 1], [], []>} : vector<2x32xf32>, vector<32x32xf32>, vector<2x32xf32> -> vector<2x32xf32>
    %c0_3 = arith.constant 0 : index
    %c0_4 = arith.constant 0 : index
    %3 = vector.load %arg3[%c0_3, %c0_4] : memref<1x32xf32, #tpu.memory_space<vmem>>, vector<1x32xf32>
    %4 = vector.broadcast %3 : vector<1x32xf32> to vector<2x32xf32>
    %5 = arith.addf %2, %4 : vector<2x32xf32>
    %cst_5 = arith.constant 0.000000e+00 : f32
    %6 = vector.broadcast %cst_5 : f32 to vector<2x32xf32>
    %7 = arith.maximumf %5, %6 : vector<2x32xf32>
    %c0_6 = arith.constant 0 : index
    %c0_7 = arith.constant 0 : index
    %8 = vector.load %arg4[%c0_6, %c0_7] : memref<32x32xf32, #tpu.memory_space<vmem>>, vector<32x32xf32>
    %cst_8 = arith.constant dense<0.000000e+00> : vector<2x32xf32>
    %9 = tpu.matmul %7, %8, %cst_8 {dimension_numbers = #tpu.dot_dimension_numbers<[1], [0], [0], [1], [0, 0, 1, 1], [], []>} : vector<2x32xf32>, vector<32x32xf32>, vector<2x32xf32> -> vector<2x32xf32>
    %c0_9 = arith.constant 0 : index
    %c0_10 = arith.constant 0 : index
    %10 = vector.load %arg5[%c0_9, %c0_10] : memref<1x32xf32, #tpu.memory_space<vmem>>, vector<1x32xf32>
    %11 = vector.broadcast %10 : vector<1x32xf32> to vector<2x32xf32>
    %12 = arith.addf %9, %11 : vector<2x32xf32>
    %cst_11 = arith.constant 0.000000e+00 : f32
    %13 = vector.broadcast %cst_11 : f32 to vector<2x32xf32>
    %14 = arith.maximumf %12, %13 : vector<2x32xf32>
    %c0_12 = arith.constant 0 : index
    %c0_13 = arith.constant 0 : index
    %15 = vector.load %arg6[%c0_12, %c0_13] : memref<32x8xf32, #tpu.memory_space<vmem>>, vector<32x8xf32>
    %cst_14 = arith.constant dense<0.000000e+00> : vector<2x8xf32>
    %16 = tpu.matmul %14, %15, %cst_14 {dimension_numbers = #tpu.dot_dimension_numbers<[1], [0], [0], [1], [0, 0, 1, 1], [], []>} : vector<2x32xf32>, vector<32x8xf32>, vector<2x8xf32> -> vector<2x8xf32>
    %c0_15 = arith.constant 0 : index
    %c0_16 = arith.constant 0 : index
    %17 = vector.load %arg7[%c0_15, %c0_16] : memref<1x8xf32, #tpu.memory_space<vmem>>, vector<1x8xf32>
    %18 = vector.broadcast %17 : vector<1x8xf32> to vector<2x8xf32>
    %19 = arith.addf %16, %18 : vector<2x8xf32>
    %c0_17 = arith.constant 0 : index
    %c0_18 = arith.constant 0 : index
    %20 = vector.load %arg8[%c0_17, %c0_18] : memref<2x8xf32, #tpu.memory_space<vmem>>, vector<2x8xf32>
    tpu.vector_store %arg8[%c0_17, %c0_18], %19 {strides = array<i32>} : memref<2x8xf32, #tpu.memory_space<vmem>>, vector<2x8xf32>,
    return
  }
  func.func @transform_0(%arg0: i32) -> (i32, i32) {
    %c0_i32 = arith.constant 0 : i32
    %c0_i32_0 = arith.constant 0 : i32
    return %arg0, %c0_i32 : i32, i32
  }
  func.func @transform_1(%arg0: i32) -> (i32, i32) {
    %c0_i32 = arith.constant 0 : i32
    %c0_i32_0 = arith.constant 0 : i32
    %c0_i32_1 = arith.constant 0 : i32
    return %c0_i32, %c0_i32_0 : i32, i32
  }
  func.func @transform_2(%arg0: i32) -> (i32, i32) {
    %c0_i32 = arith.constant 0 : i32
    %c0_i32_0 = arith.constant 0 : i32
    %c0_i32_1 = arith.constant 0 : i32
    return %c0_i32, %c0_i32_0 : i32, i32
  }
  func.func @transform_3(%arg0: i32) -> (i32, i32) {
    %c0_i32 = arith.constant 0 : i32
    %c0_i32_0 = arith.constant 0 : i32
    %c0_i32_1 = arith.constant 0 : i32
    return %c0_i32, %c0_i32_0 : i32, i32
  }
  func.func @transform_4(%arg0: i32) -> (i32, i32) {
    %c0_i32 = arith.constant 0 : i32
    %c0_i32_0 = arith.constant 0 : i32
    %c0_i32_1 = arith.constant 0 : i32
    return %c0_i32, %c0_i32_0 : i32, i32
  }
  func.func @transform_5(%arg0: i32) -> (i32, i32) {
    %c0_i32 = arith.constant 0 : i32
    %c0_i32_0 = arith.constant 0 : i32
    %c0_i32_1 = arith.constant 0 : i32
    return %c0_i32, %c0_i32_0 : i32, i32
  }
  func.func @transform_6(%arg0: i32) -> (i32, i32) {
    %c0_i32 = arith.constant 0 : i32
    %c0_i32_0 = arith.constant 0 : i32
    %c0_i32_1 = arith.constant 0 : i32
    return %c0_i32, %c0_i32_0 : i32, i32
  }
  func.func @transform_7(%arg0: i32) -> (i32, i32) {
    %c0_i32 = arith.constant 0 : i32
    %c0_i32_0 = arith.constant 0 : i32
    return %arg0, %c0_i32 : i32, i32
  }
}

</mosaic_0001>

<bundles_post_ra>
// kernel: net_forward.1
= control target key start
LH: loop header
LB: loop body
LE: loop exit
PB: predicated region body
PF: predicated region fallthrough
CT: control target
= control target key end

     0   :  { %12 = vsyncpa [#allocation3], 0  ;;  %s554_s0 = inlined_call_operand.vmem [shape: f32[2,32], index: 0, kind: input, shape index: {}]   ;;  %s555_s1 = inlined_call_operand.vmem [shape: f32[32,32], index: 1, kind: input, shape index: {}]   ;;  %s556_s2 = inlined_call_operand.vmem [shape: f32[1,32], index: 2, kind: input, shape index: {}]   ;;  %s557_s3 = inlined_call_operand.hbm [shape: f32[32,32], index: 3, kind: input, shape index: {}]   ;;  %s558_s4 = inlined_call_operand.vmem [shape: f32[1,32], index: 4, kind: input, shape index: {}]   ;;  %s559_s5 = inlined_call_operand.vmem [shape: f32[32,8], index: 5, kind: input, shape index: {}]   ;;  %s560_s6 = inlined_call_operand.vmem [shape: f32[1,8], index: 6, kind: input, shape index: {}]   ;;  %s561_s7 = inlined_call_operand.hbm [shape: f32[2,8], index: 7, kind: output, shape index: {}]  }
   0x1   :  { %13 = vsyncpa [#allocation4], 0  ;;  %s441_s24 = smov [#allocation2]   ;;  %s393_s28 = scalar_lea.hbm %s557_s3, 512 }
   0x2   :  { %s25_s25 = sshll.u32 %s441_s24, 4  ;;  %p394_p0 = scmp.ne.s32.totalorder %s557_s3, %s393_s28  ;;  %s26_s25 = int_to_ptr.vmem [resolvable:$true] %s25_s25 }
   0x3   :  { %p397_p1 = scmp.lt.u32.totalorder %s393_s28, %s557_s3 }
   0x5   :  { %p399_p2 = pnand %p397_p1, %p394_p0 }
   0x7   :  { %402 = shalt.err (!%p399_p2)
}
   0x8   :  { %s403_s10 = scalar_lea.vmem %s26_s25, 512  ;;  %p408_p4 = scmp.lt.s32.totalorder %s26_s25, %s26_s25 }
   0x9   :  { %p404_p3 = scmp.ne.s32.totalorder %s26_s25, %s403_s10  ;;  %p409_p5 = scmp.lt.s32.totalorder %s403_s10, %s403_s10 }
   0xb   :  { %p410_p6 = por %p409_p5, %p408_p4 }
   0xd   :  { %p411_p7 = pnand %p410_p6, %p404_p3 }
   0xf   :  { %414 = shalt.err (!%p411_p7)
}
  0x10   :  { %s442_s11 = smov 128   ;;  %s443_s12 = smov 8  }
  0x11   :  { %31 = dma.hbm_to_vmem [thread:$0]  %s557_s3, 512, %s26_s25, [#allocation3], %s442_s11, %s442_s11, %s443_s12  }
  0x12   :  { %437 = dma.done.wait [#allocation3], 512  }
  0x13   :  { %438 = vsyncadd [#allocation3], 4294966784  ;;  %v444_v0 = vmov 0.0|0.0   ;;  %vm445_vm0 = vmmov 0   ;;  %v446_v1 = vmov 0.0   ;;  %v42_v2 = vld [vmem:[%s555_s1] sm:$0xff] }
  0x14   :  { %368 = vmatprep.subr.bf16.mxu0 %v444_v0  ;;  %343 = vmatprep.mubr.msk.f32.mxu0 %vm445_vm0, %v446_v1  ;;  %v43_v3 = vld [vmem:[%s555_s1 + $0x8] sm:$0xff]  ;;  %v44_v4 = vld [vmem:[%s555_s1 + $0x10] sm:$0xff]  ;;  %v45_v6 = vld [vmem:[%s555_s1 + $0x18] sm:$0xff]  ;;  %vm53_vm1 = vcmask 261120   ;;  %s447_s12 = smov [#allocation5]   ;;  %vm297_vm2 = vcmask 58368  }
  0x15   :  { %374 = vmatprep.subr.bf16.mxu1 %v444_v0  ;;  %354 = vmatprep.mubr.msk.f32.mxu1 %vm445_vm0, %v446_v1  ;;  %v369_v5 = vpack.c.bf16 %v43_v3, %v42_v2  ;;  %v128_v7 = vld [vmem:[#allocation2] sm:$0xff]  ;;  %v129_v8 = vld [vmem:[#allocation2 + $0x8] sm:$0xff]  ;;  %v372_v9 = vpack.c.bf16 %v45_v6, %v44_v4  ;;  %v130_v12 = vld [vmem:[#allocation2 + $0x10] sm:$0xff]  ;;  %s305_s13 = sshll.u32 %s447_s12, 4  ;;  %s306_s13 = int_to_ptr.vmem [resolvable:$true] %s305_s13 }
  0x16   :  { %v375_v10 = vpack.c.bf16 %v129_v8, %v128_v7  ;;  %v41_v11 = vld [vmem:[%s554_s0] sm:$0x3]  ;;  %v131_v13 = vld [vmem:[#allocation2 + $0x18] sm:$0xff]  ;;  %v214_v16 = vld [vmem:[%s559_s5 + $0x8] sm:$0xff]  ;;  %p420_p9 = scmp.lt.s32.totalorder %s306_s13, %s306_s13 }
  0x17   :  { %370 = vmatpush3.bf16.msra.mxu0 %v369_v5  ;;  %v378_v14 = vpack.c.bf16 %v131_v13, %v130_v12  ;;  %v213_v15 = vld [vmem:[%s559_s5] sm:$0xff]  ;;  %v215_v23 = vld [vmem:[%s559_s5 + $0x10] sm:$0xff]  ;;  %v216_v24 = vld [vmem:[%s559_s5 + $0x18] sm:$0xff]  ;;  %s415_s5 = scalar_lea.vmem %s306_s13, 32 }
  0x18   :  { %371 = vmatprep.subr.bf16.mxu0 %v444_v0  ;;  %376 = vmatpush3.bf16.msra.mxu1 %v375_v10  ;;  %v381_v17 = vpack.c.bf16 %v214_v16, %v213_v15  ;;  %v314_v18 = vld [vmem:[%s556_s2] ss:$0 sm:$0xff]  ;;  %v384_v25 = vpack.c.bf16 %v216_v24, %v215_v23  ;;  %p416_p8 = scmp.ne.s32.totalorder %s306_s13, %s415_s5  ;;  %p421_p10 = scmp.lt.s32.totalorder %s415_s5, %s415_s5 }
  0x19   :  { %377 = vmatprep.subr.bf16.mxu1 %v444_v0  ;;  %v316_v26 = vld [vmem:[%s558_s4] ss:$0 sm:$0xff] }
  0x1a   :  { %v318_v31 = vld [vmem:[%s560_s6] ss:$0 sm:$0xff]  ;;  %p422_p11 = por %p421_p10, %p420_p9 }
  0x1b   :  { %373 = vmatpush3.bf16.msra.mxu0 %v372_v9 }
  0x1c   :  { %380 = vmatprep.subr.bf16.mxu0 %v444_v0  ;;  %379 = vmatpush3.bf16.msra.mxu1 %v378_v14  ;;  %p423_p12 = pnand %p422_p11, %p416_p8 }
  0x1e   :  { %344 = vmatmul.mubr.msk.f32.vlgmr.msra.gmra.mrb[0].mxu0 %vm53_vm1, %v41_v11 }
  0x1f   :  { %365 = vmatprep.mubr.msk.f32.mxu0 %vm445_vm0, %v446_v1  ;;  %382 = vmatpush3.bf16.msra.mxu0 %v381_v17 }
  0x20   :  { %383 = vmatprep.subr.bf16.mxu0 %v444_v0 }
  0x23   :  { %385 = vmatpush3.bf16.msra.mxu0 %v384_v25 }
  0xf1   :  { %v123_v19 = vpop.f32.mrb[0].mxu0 }
  0xf2   :  { %v124_v20 = vadd.f32 %v314_v18, %v123_v19  ;;  %v345_v21 = vpop.f32.mrb[1].mxu0 }
  0xf4   :  { %v127_v22 = vmax.f32 %v124_v20, 0.0 }
  0xf6   :  { %355 = vmatmul.mubr.msk.f32.vlgmr.msra.gmra.mrb[0].mxu1 %vm53_vm1, %v127_v22 }
 0x1c9   :  { %v208_v27 = vpop.f32.mrb[0].mxu1 }
 0x1ca   :  { %v209_v28 = vadd.f32 %v316_v26, %v208_v27  ;;  %v356_v29 = vpop.f32.mrb[1].mxu1 }
 0x1cc   :  { %v212_v30 = vmax.f32 %v209_v28, 0.0 }
 0x1ce   :  { %366 = vmatmul.mubr.msk.f32.vlgmr.msra.gmra.mrb[2].mxu0 %vm53_vm1, %v212_v30 }
 0x2a1   :  { %v293_v32 = vpop.f32.mrb[2].mxu0 }
 0x2a2   :  { %v294_v33 = vadd.f32 %v318_v31, %v293_v32  ;;  %v367_v34 = vpop.f32.mrb[3].mxu0 }
 0x2a4   :  { %298 = vst.msk [vmem:[#allocation5] sm:$0x3] %vm297_vm2, %v294_v33 }
 0x2a5   :  { %426 = shalt.err (!%p423_p12)
}
 0x2a6   :  { %s427_s15 = scalar_lea.hbm %s561_s7, 32 }
 0x2a7   :  { %p428_p13 = scmp.ne.s32.totalorder %s561_s7, %s427_s15  ;;  %p431_p0 = scmp.lt.u32.totalorder %s427_s15, %s561_s7 }
 0x2a9   :  { %p433_p1 = pnand %p431_p0, %p428_p13 }
 0x2ab   :  { %436 = shalt.err (!%p433_p1)
}
 0x2ac   :  { %308 = dma.vmem_to_hbm [thread:$0]  %s306_s13, 32, %s561_s7, [#allocation4]  }
 0x2ad   :  { %439 = dma.done.wait [#allocation4], 32  }
 0x2ae   :  { %440 = vsyncadd [#allocation4], 4294967264 }
 0x2af   :  { %312 = vsyncpa [#allocation3], 1 }
 0x2b0   :  { %313 = vsyncpa [#allocation4], 1 }

</bundles_post_ra>
